<compile_context>
chip_gen: v7x
topology: tpu7x:2x2x1
jax: 0.10.0
libtpu: 0.0.40
codegen_flags: <defaults>
</compile_context>

<pallas_src>
import math
from functools import partial

import jax
import jax.numpy as jnp
from jax.experimental import pallas as pl
from jax.experimental.pallas import tpu as pltpu


# Batches at or below this take the single no-grid VMEM-resident path.
# Kept small so medium batches still get >=2 grid blocks (both v7x TCs busy).
_NO_GRID_MAX_BATCH = 256


def _round_up(n, m):
    return ((n + m - 1) // m) * m


def actor_kernel(x_ref, w1_ref, b1_ref, w2_ref, b2_ref, out_ref):
    # Cast activations to bf16 only at the MXU boundary (x stays f32 in HBM).
    x = x_ref[...].astype(w1_ref.dtype)
    # fc1: bf16 MXU matmul, f32 accumulation; bias + ReLU in f32 (VPU).
    h = jnp.dot(x, w1_ref[...], preferred_element_type=jnp.float32)
    h = jnp.maximum(h + b1_ref[...], 0.0)
    # fc2: bf16 MXU matmul, f32 accumulation; bias in f32.
    logits = jnp.dot(
        h.astype(w2_ref.dtype), w2_ref[...], preferred_element_type=jnp.float32
    )
    out_ref[...] = (logits + b2_ref[...]).astype(out_ref.dtype)


def prepare_actor_params(w1, b1, w2, b2):
    """One-time parameter prep (hoisted out of the per-call path).

    Weights -> bf16 for the MXU; biases stay f32 (VPU math) with shape
    (1, out_features) so they broadcast over the batch inside the kernel.
    """
    return (
        w1.astype(jnp.bfloat16),
        b1.reshape(1, -1).astype(jnp.float32),
        w2.astype(jnp.bfloat16),
        b2.reshape(1, -1).astype(jnp.float32),
    )


@partial(jax.jit, static_argnames=("block_batch",))
def actor_forward(x, w1, b1, w2, b2, *, block_batch=1024):
    """Fused Actor.forward.

    x:  (batch, state_dim)       f32
    w1: (state_dim, hidden_dim)  bf16   b1: (1, hidden_dim)  f32
    w2: (hidden_dim, action_dim) bf16   b2: (1, action_dim)  f32
    returns logits (batch, action_dim) f32
    """
    batch, state_dim = x.shape
    hidden_dim = w1.shape[1]
    action_dim = w2.shape[1]

    cost = pl.CostEstimate(
        flops=2 * batch * state_dim * hidden_dim + 2 * batch * hidden_dim * action_dim,
        transcendentals=0,
        bytes_accessed=(
            x.size * 4 + w1.size * 2 + w2.size * 2
            + b1.size * 4 + b2.size * 4 + batch * action_dim * 4
        ),
    )

    if batch <= _NO_GRID_MAX_BATCH:
        # Small batch: everything resident in VMEM, no grid / pipeline overhead,
        # no padding anywhere (full-array blocks are layout-legal at any size).
        vmem_spec = pl.BlockSpec(memory_space=pltpu.MemorySpace.VMEM)
        return pl.pallas_call(
            actor_kernel,
            out_shape=jax.ShapeDtypeStruct((batch, action_dim), jnp.float32),
            in_specs=[vmem_spec] * 5,
            out_specs=vmem_spec,
            cost_estimate=cost,
        )(x, w1, b1, w2, b2)

    # Large batch: tile only the batch dim.  Pick the tile to minimize row
    # padding (16-row granularity for packed bf16 sublanes) and always keep
    # >=2 blocks so the "parallel" axis can shard across both v7x TensorCores.
    num_blocks = max(2, pl.cdiv(batch, block_batch))
    bb = _round_up(pl.cdiv(batch, num_blocks), 16)
    num_blocks = max(2, pl.cdiv(batch, bb))
    bp = bb * num_blocks

    x_p = x if bp == batch else jnp.pad(x, ((0, bp - batch), (0, 0)))

    out_p = pl.pallas_call(
        actor_kernel,
        out_shape=jax.ShapeDtypeStruct((bp, action_dim), jnp.float32),
        grid=(num_blocks,),
        in_specs=[
            # x block: last dim == full array dim (state_dim), so no lane
            # padding / pre-cast round-trip through HBM is needed.
            pl.BlockSpec((bb, state_dim), lambda i: (i, 0)),
            # Tiny weights/biases: constant index_map -> VMEM-resident.
            pl.BlockSpec((state_dim, hidden_dim), lambda i: (0, 0)),
            pl.BlockSpec((1, hidden_dim), lambda i: (0, 0)),
            pl.BlockSpec((hidden_dim, action_dim), lambda i: (0, 0)),
            pl.BlockSpec((1, action_dim), lambda i: (0, 0)),
        ],
        # Output written at true width (action_dim): 16x fewer bytes than a
        # 128-lane-padded f32 slab; full-dim block keeps it layout-legal.
        out_specs=pl.BlockSpec((bb, action_dim), lambda i: (i, 0)),
        compiler_params=pltpu.CompilerParams(
            dimension_semantics=("parallel",),
        ),
        cost_estimate=cost,
    )(x_p, w1, b1, w2, b2)

    return out_p if bp == batch else out_p[:batch]


def init_actor_params(key, state_dim, action_dim, hidden_dim):
    """Deterministic init mimicking nn.Linear's U(-1/sqrt(fan_in), 1/sqrt(fan_in))."""
    k1, k2, k3, k4 = jax.random.split(key, 4)
    bound1 = 1.0 / math.sqrt(state_dim)
    bound2 = 1.0 / math.sqrt(hidden_dim)
    w1 = jax.random.uniform(k1, (state_dim, hidden_dim), jnp.float32, -bound1, bound1)
    b1 = jax.random.uniform(k2, (1, hidden_dim), jnp.float32, -bound1, bound1)
    w2 = jax.random.uniform(k3, (hidden_dim, action_dim), jnp.float32, -bound2, bound2)
    b2 = jax.random.uniform(k4, (1, action_dim), jnp.float32, -bound2, bound2)
    return w1, b1, w2, b2


def _reference(x, w1, b1, w2, b2):
    h = jnp.maximum(x @ w1 + b1, 0.0)
    return h @ w2 + b2


if __name__ == "__main__":
    # Shapes consistent with the module: state_dim=16, hidden_dim=32, action_dim=8.
    state_dim, hidden_dim, action_dim = 16, 32, 8
    key = jax.random.PRNGKey(0)
    kx, kp, kx2, kx3 = jax.random.split(key, 4)
    w1, b1, w2, b2 = init_actor_params(kp, state_dim, action_dim, hidden_dim)
    # One-time parameter prep (bf16 weights, f32 biases) -- reused across calls.
    w1p, b1p, w2p, b2p = prepare_actor_params(w1, b1, w2, b2)

    # Path 1: small batch -> single no-grid VMEM-resident kernel.
    batch = 8
    x = jax.random.normal(kx, (batch, state_dim), jnp.float32)
    logits = actor_forward(x, w1p, b1p, w2p, b2p)
    jax.block_until_ready(logits)
    ref = _reference(x, w1, b1, w2, b2)
    assert logits.shape == (batch, action_dim)
    assert jnp.allclose(logits, ref, atol=3e-2, rtol=3e-2), "small-batch mismatch"

    # Path 2: batch-tiled grid (3 blocks, no row padding needed).
    batch2 = 384
    x2 = jax.random.normal(kx2, (batch2, state_dim), jnp.float32)
    logits2 = actor_forward(x2, w1p, b1p, w2p, b2p, block_batch=128)
    jax.block_until_ready(logits2)
    ref2 = _reference(x2, w1, b1, w2, b2)
    assert logits2.shape == (batch2, action_dim)
    assert jnp.allclose(logits2, ref2, atol=3e-2, rtol=3e-2), "tiled-batch mismatch"

    # Path 3: batch-tiled grid with row padding (600 -> 2 blocks of 304 rows).
    batch3 = 600
    x3 = jax.random.normal(kx3, (batch3, state_dim), jnp.float32)
    logits3 = actor_forward(x3, w1p, b1p, w2p, b2p)
    jax.block_until_ready(logits3)
    ref3 = _reference(x3, w1, b1, w2, b2)
    assert logits3.shape == (batch3, action_dim)
    assert jnp.allclose(logits3, ref3, atol=3e-2, rtol=3e-2), "padded-batch mismatch"

    print("KERNEL_OK")
</pallas_src>

<mosaic_0001>
module attributes {stable_mosaic.version = 11 : i64} {
  func.func @actor_kernel(%arg0: memref<8x16xf32, #tpu.memory_space<vmem>>, %arg1: memref<16x32xbf16, #tpu.memory_space<vmem>>, %arg2: memref<1x32xf32, #tpu.memory_space<vmem>>, %arg3: memref<32x8xbf16, #tpu.memory_space<vmem>>, %arg4: memref<1x8xf32, #tpu.memory_space<vmem>>, %arg5: memref<8x8xf32, #tpu.memory_space<vmem>>) attributes {dimension_semantics = [], scalar_prefetch = 0 : i64, scratch_operands = 0 : i64, tpu.core_type = #tpu.core_type<tc>} {
    %c0 = arith.constant 0 : index
    %c0_0 = arith.constant 0 : index
    %0 = vector.load %arg0[%c0, %c0_0] : memref<8x16xf32, #tpu.memory_space<vmem>>, vector<8x16xf32>
    %1 = arith.truncf %0 : vector<8x16xf32> to vector<8x16xbf16>
    %c0_1 = arith.constant 0 : index
    %c0_2 = arith.constant 0 : index
    %2 = vector.load %arg1[%c0_1, %c0_2] : memref<16x32xbf16, #tpu.memory_space<vmem>>, vector<16x32xbf16>
    %cst = arith.constant dense<0.000000e+00> : vector<8x32xf32>
    %3 = tpu.matmul %1, %2, %cst {dimension_numbers = #tpu.dot_dimension_numbers<[1], [0], [0], [1], [0, 0, 1, 1], [], []>} : vector<8x16xbf16>, vector<16x32xbf16>, vector<8x32xf32> -> vector<8x32xf32>
    %c0_3 = arith.constant 0 : index
    %c0_4 = arith.constant 0 : index
    %4 = vector.load %arg2[%c0_3, %c0_4] : memref<1x32xf32, #tpu.memory_space<vmem>>, vector<1x32xf32>
    %5 = vector.broadcast %4 : vector<1x32xf32> to vector<8x32xf32>
    %6 = arith.addf %3, %5 : vector<8x32xf32>
    %cst_5 = arith.constant 0.000000e+00 : f32
    %7 = vector.broadcast %cst_5 : f32 to vector<8x32xf32>
    %8 = arith.maximumf %6, %7 : vector<8x32xf32>
    %9 = arith.truncf %8 : vector<8x32xf32> to vector<8x32xbf16>
    %c0_6 = arith.constant 0 : index
    %c0_7 = arith.constant 0 : index
    %10 = vector.load %arg3[%c0_6, %c0_7] : memref<32x8xbf16, #tpu.memory_space<vmem>>, vector<32x8xbf16>
    %cst_8 = arith.constant dense<0.000000e+00> : vector<8x8xf32>
    %11 = tpu.matmul %9, %10, %cst_8 {dimension_numbers = #tpu.dot_dimension_numbers<[1], [0], [0], [1], [0, 0, 1, 1], [], []>} : vector<8x32xbf16>, vector<32x8xbf16>, vector<8x8xf32> -> vector<8x8xf32>
    %c0_9 = arith.constant 0 : index
    %c0_10 = arith.constant 0 : index
    %12 = vector.load %arg4[%c0_9, %c0_10] : memref<1x8xf32, #tpu.memory_space<vmem>>, vector<1x8xf32>
    %13 = vector.broadcast %12 : vector<1x8xf32> to vector<8x8xf32>
    %14 = arith.addf %11, %13 : vector<8x8xf32>
    %c0_11 = arith.constant 0 : index
    %c0_12 = arith.constant 0 : index
    %15 = vector.load %arg5[%c0_11, %c0_12] : memref<8x8xf32, #tpu.memory_space<vmem>>, vector<8x8xf32>
    tpu.vector_store %arg5[%c0_11, %c0_12], %14 {strides = array<i32>} : memref<8x8xf32, #tpu.memory_space<vmem>>, vector<8x8xf32>,
    return
  }
}

</mosaic_0001>

<bundles_post_ra>
// kernel: actor_forward.1
= control target key start
LH: loop header
LB: loop body
LE: loop exit
PB: predicated region body
PF: predicated region fallthrough
CT: control target
= control target key end

     0   :  { %v224_v1 = vmov 0.0   ;;  %vm39_vm0 = vcmask 130048   ;;  %vm225_vm1 = vmmov 0   ;;  %s287_s0 = inlined_call_operand.vmem [shape: f32[8,16], index: 0, kind: input, shape index: {}]   ;;  %s288_s1 = inlined_call_operand.vmem [shape: bf16[16,32], index: 1, kind: input, shape index: {}]   ;;  %s289_s2 = inlined_call_operand.vmem [shape: f32[1,32], index: 2, kind: input, shape index: {}]   ;;  %s290_s3 = inlined_call_operand.vmem [shape: bf16[32,8], index: 3, kind: input, shape index: {}]   ;;  %s291_s4 = inlined_call_operand.vmem [shape: f32[1,8], index: 4, kind: input, shape index: {}]   ;;  %s292_s5 = inlined_call_operand.hbm [shape: f32[8,8], index: 5, kind: output, shape index: {}]  }
   0x1   :  { %v197_v0 = vld [vmem:[%s288_s1] sm:$0xff]   ;;  %180 = vmatprep.subr.bf16.mxu0 %v224_v1  ;;  %186 = vmatprep.subr.bf16.mxu1 %v224_v1 }
   0x2   :  { %v22_v2 = vld [vmem:[%s287_s0] sm:$0xff]  ;;  %181 = vmatpush3.bf16.msra.mxu0 %v197_v0  ;;  %182 = vmatprep.mubr.msk.bf16.mxu0 %vm225_vm1, %v224_v1 }
   0x3   :  { %v23_v3 = vpack.c.bf16 %v22_v2, %v22_v2  ;;  %190 = vmatprep.mubr.msk.bf16.mxu1 %vm225_vm1, %v224_v1 }
   0x4   :  { %10 = vsyncpa [#allocation3], 0  ;;  %v198_v4 = vld [vmem:[%s290_s3] sm:$0xff]   ;;  %v199_v5 = vld [vmem:[%s290_s3 + $0x8] sm:$0xff]   ;;  %vm108_vm2 = vcmask 261120   ;;  %s226_s28 = smov [#allocation2]  }
   0x5   :  { %183 = vmatmul.mubr.msk.bf16.vlgmr.msra.gmra.mrb[0].mxu0 %vm39_vm0, %v23_v3  ;;  %187 = vmatpush3.bf16.msra.mxu1 %v198_v4  ;;  %v168_v6 = vld [vmem:[%s289_s2] ss:$0 sm:$0xff]  ;;  %s160_s3 = sshll.u32 %s226_s28, 4  ;;  %vm152_vm3 = vcmask 64512   ;;  %s161_s3 = int_to_ptr.vmem [resolvable:$true] %s160_s3 }
   0x6   :  { %188 = vmatprep.subr.bf16.mxu1 %v224_v1  ;;  %v171_v14 = vld [vmem:[%s291_s4] ss:$0 sm:$0xff]  ;;  %s200_s2 = scalar_lea.vmem %s161_s3, 128  ;;  %p205_p1 = scmp.lt.s32.totalorder %s161_s3, %s161_s3 }
   0x7   :  { %p201_p0 = scmp.ne.s32.totalorder %s161_s3, %s200_s2  ;;  %p206_p2 = scmp.lt.s32.totalorder %s200_s2, %s200_s2 }
   0x9   :  { %189 = vmatpush3.bf16.msra.mxu1 %v199_v5  ;;  %p207_p3 = por %p206_p2, %p205_p1 }
   0xb   :  { %p208_p4 = pnand %p207_p3, %p201_p0 }
  0xd8   :  { %v77_v7 = vpop.f32.mrb[0].mxu0 }
  0xd9   :  { %v78_v8 = vadd.f32 %v168_v6, %v77_v7  ;;  %v184_v9 = vpop.f32.mrb[1].mxu0 }
  0xda   :  { %v80_v10 = vpop.f32.mrb[2].mxu0 }
  0xdb   :  { %v83_v11 = vmax.f32 %v78_v8, 0.0  ;;  %v185_v12 = vpop.f32.mrb[3].mxu0 }
  0xdd   :  { %v84_v13 = vpack.c.bf16 %v83_v11, %v83_v11 }
  0xdf   :  { %191 = vmatmul.mubr.msk.bf16.vlgmr.msra.gmra.mrb[0].mxu1 %vm108_vm2, %v84_v13 }
 0x1b2   :  { %v146_v15 = vpop.f32.mrb[0].mxu1 }
 0x1b3   :  { %v147_v16 = vadd.f32 %v171_v14, %v146_v15  ;;  %v192_v17 = vpop.f32.mrb[1].mxu1 }
 0x1b4   :  { %v149_v18 = vpop.f32.mrb[2].mxu1 }
 0x1b5   :  { %v193_v19 = vpop.f32.mrb[3].mxu1  ;;  %153 = vst.msk [vmem:[#allocation2] sm:$0xff] %vm152_vm3, %v147_v16 }
 0x1b6   :  { %211 = shalt.err (!%p208_p4)
}
 0x1b7   :  { %s212_s4 = scalar_lea.hbm %s292_s5, 128 }
 0x1b8   :  { %p213_p5 = scmp.ne.s32.totalorder %s292_s5, %s212_s4  ;;  %p216_p6 = scmp.lt.u32.totalorder %s212_s4, %s292_s5 }
 0x1ba   :  { %p218_p7 = pnand %p216_p6, %p213_p5 }
 0x1bc   :  { %221 = shalt.err (!%p218_p7)
}
 0x1bd   :  { %163 = dma.vmem_to_hbm [thread:$0]  %s161_s3, 128, %s292_s5, [#allocation3]  }
 0x1be   :  { %222 = dma.done.wait [#allocation3], 128  }
 0x1bf   :  { %223 = vsyncadd [#allocation3], 4294967168 }
 0x1c0   :  { %167 = vsyncpa [#allocation3], 1 }

</bundles_post_ra>
